<compile_context>
chip_gen: v6e
topology: v6e:2x2x1
jax: 0.10.0
libtpu: 0.0.40
codegen_flags: <defaults>
</compile_context>

<pallas_src>
import numpy as np
import jax
import jax.numpy as jnp
from jax.experimental import pallas as pl
from jax.experimental.pallas import tpu as pltpu

_LANE = 128
_LANE_CAP = 2048                      # lane-block width cap (elements)
_TILE_BYTES_CAP = 2 * 1024 * 1024     # per-tile cap: 4 live buffers ~= 8 MiB
_VMEM_LIMIT_BYTES = 32 * 1024 * 1024  # explicit scoped-VMEM budget (all gens)


def _copy_kernel(x_ref, o_ref):
    # Pure data movement: identity copy of one tile.
    o_ref[...] = x_ref[...]


def _pick_lane(total: int) -> int:
    """Largest multiple of 128 (<= _LANE_CAP) that evenly divides `total`.

    Returns 0 if `total` is not divisible by 128 at all.
    """
    for cand in range(_LANE_CAP, _LANE - 1, -_LANE):
        if total % cand == 0:
            return cand
    return 0


def _copy_slab(slab: jax.Array) -> jax.Array:
    """Tiled, pipelined identity copy of an engineered (rows, lane) slab."""
    rows, lane = slab.shape
    itemsize = jnp.dtype(slab.dtype).itemsize

    # Row block: multiple of 32 (dense sublanes for f32/bf16/int8), sized so
    # one tile stays under _TILE_BYTES_CAP.  Full-extent rows when small.
    cap_rows = max(32, ((_TILE_BYTES_CAP // (lane * itemsize)) // 32) * 32)
    tm = rows if rows <= cap_rows else cap_rows
    grid = (pl.cdiv(rows, tm),)  # ragged tail handled by Pallas masking

    # NOTE: if the caller wants buffer donation, add
    # input_output_aliases={0: 0} here (capacity win only, not bandwidth).
    return pl.pallas_call(
        _copy_kernel,
        out_shape=jax.ShapeDtypeStruct((rows, lane), slab.dtype),
        grid=grid,
        in_specs=[pl.BlockSpec((tm, lane), lambda i: (i, 0))],
        out_specs=pl.BlockSpec((tm, lane), lambda i: (i, 0)),
        compiler_params=pltpu.CompilerParams(
            dimension_semantics=("parallel",),       # v7x: split across 2 TCs
            vmem_limit_bytes=_VMEM_LIMIT_BYTES,
        ),
        cost_estimate=pl.CostEstimate(
            flops=0,
            transcendentals=0,
            bytes_accessed=2 * rows * lane * itemsize,
        ),
    )(slab)


def _flatten_copy(x: jax.Array) -> jax.Array:
    """Explicit Pallas-materialized flatten: x -> copy of x.reshape(B, D)."""
    b = x.shape[0]
    d = int(np.prod(x.shape[1:]))
    total = b * d
    itemsize = jnp.dtype(x.dtype).itemsize

    flat = jnp.reshape(x, (total,))          # metadata-only (row-major)
    lane = _pick_lane(total)

    if lane:
        # Engineered slab: always full lane-dense (.., 128k) tiles.
        slab = jnp.reshape(flat, (total // lane, lane))
        out = _copy_slab(slab)
        return jnp.reshape(out, (b, d))

    if total * itemsize <= _TILE_BYTES_CAP:
        # Small & not a multiple of 128: one whole-array block (always legal).
        x2 = jnp.reshape(flat, (b, d))
        return pl.pallas_call(
            _copy_kernel,
            out_shape=jax.ShapeDtypeStruct((b, d), x.dtype),
            compiler_params=pltpu.CompilerParams(
                vmem_limit_bytes=_VMEM_LIMIT_BYTES),
        )(x2)

    # Large & not a multiple of 128: pad the 1-D slab to a lane multiple,
    # copy the engineered slab, then slice back (pad/slice are cheap XLA ops).
    pad_lane = 1024
    rows = pl.cdiv(total, pad_lane)
    pad = rows * pad_lane - total
    slab = jnp.reshape(jnp.pad(flat, (0, pad)), (rows, pad_lane))
    out = _copy_slab(slab)
    return jnp.reshape(jnp.reshape(out, (-1,))[:total], (b, d))


def flatten(x: jax.Array, materialize: bool = False) -> jax.Array:
    """Pallas equivalent of Flatten.forward.

    Default: metadata-only reshape (zero-cost, matches torch .view).
    materialize=True: explicit Pallas identity-copy of the flattened slab.
    """
    if not materialize:
        b = x.shape[0]
        d = int(np.prod(x.shape[1:]))
        return jnp.reshape(x, (b, d))
    return _flatten_copy(x)


if __name__ == "__main__":
    key = jax.random.PRNGKey(0)
    # Small NCHW input consistent with a conv-style feature map.
    x = jax.random.normal(key, (2, 4, 16, 16), dtype=jnp.float32)

    # Production path: metadata-only reshape (no kernel).
    out_meta = flatten(x)

    # Explicit Pallas copy path (exercises the kernel).
    out_kernel = flatten(x, materialize=True)
    jax.block_until_ready(out_kernel)

    ref = np.asarray(x).reshape(2, -1)
    assert out_kernel.shape == (2, 4 * 16 * 16), out_kernel.shape
    assert out_kernel.dtype == x.dtype
    np.testing.assert_array_equal(np.asarray(out_kernel), ref)
    np.testing.assert_array_equal(np.asarray(out_meta), ref)

    print("KERNEL_OK")
</pallas_src>

<mosaic_0001>
module attributes {stable_mosaic.version = 11 : i64} {
  func.func @_copy_kernel(%arg0: i32, %arg1: memref<1x2048xf32, #tpu.memory_space<vmem>>, %arg2: memref<1x2048xf32, #tpu.memory_space<vmem>>) attributes {dimension_semantics = [#tpu.dimension_semantics<parallel>], iteration_bounds = array<i64: 1>, scalar_prefetch = 0 : i64, scratch_operands = 0 : i64, tpu.core_type = #tpu.core_type<tc>, window_params = [{transform_indices = @transform_0, window_bounds = array<i64: 1, 2048>}, {transform_indices = @transform_1, window_bounds = array<i64: 1, 2048>}]} {
    %c0 = arith.constant 0 : index
    %c0_0 = arith.constant 0 : index
    %0 = vector.load %arg1[%c0, %c0_0] : memref<1x2048xf32, #tpu.memory_space<vmem>>, vector<1x2048xf32>
    %c0_1 = arith.constant 0 : index
    %c0_2 = arith.constant 0 : index
    %1 = vector.load %arg2[%c0_1, %c0_2] : memref<1x2048xf32, #tpu.memory_space<vmem>>, vector<1x2048xf32>
    tpu.vector_store %arg2[%c0_1, %c0_2], %0 {strides = array<i32>} : memref<1x2048xf32, #tpu.memory_space<vmem>>, vector<1x2048xf32>,
    return
  }
  func.func @transform_0(%arg0: i32) -> (i32, i32) {
    %c0_i32 = arith.constant 0 : i32
    %c0_i32_0 = arith.constant 0 : i32
    return %arg0, %c0_i32 : i32, i32
  }
  func.func @transform_1(%arg0: i32) -> (i32, i32) {
    %c0_i32 = arith.constant 0 : i32
    %c0_i32_0 = arith.constant 0 : i32
    return %arg0, %c0_i32 : i32, i32
  }
}

</mosaic_0001>

<bundles_post_ra>
// kernel: tpu_custom_call.1
= control target key start
LH: loop header
LB: loop body
LE: loop exit
PB: predicated region body
PF: predicated region fallthrough
CT: control target
= control target key end

     0   :  { %6 = vsyncpa [#allocation3], 0  ;;  %s104_s0 = inlined_call_operand.hbm [shape: f32[1,2048], index: 0, kind: input, shape index: {}]   ;;  %s105_s1 = inlined_call_operand.hbm [shape: f32[1,2048], index: 1, kind: output, shape index: {}]  }
   0x1   :  { %7 = vsyncpa [#allocation4], 0  ;;  %s86_s6 = smov [#allocation2]  }
   0x2   :  { %s14_s7 = sshll.u32 %s86_s6, 4  ;;  %s15_s7 = int_to_ptr.vmem [resolvable:$true] %s14_s7 }
   0x3   :  { %s50_s8 = scalar_lea.vmem %s15_s7, 256  ;;  %p55_p1 = scmp.lt.s32.totalorder %s15_s7, %s15_s7 }
   0x4   :  { %p51_p0 = scmp.ne.s32.totalorder %s15_s7, %s50_s8  ;;  %p56_p2 = scmp.lt.s32.totalorder %s50_s8, %s50_s8 }
   0x6   :  { %p57_p3 = por %p56_p2, %p55_p1 }
   0x8   :  { %p58_p4 = pnand %p57_p3, %p51_p0 }
   0xa   :  { %61 = shalt.err (!%p58_p4)
}
   0xb   :  { %17 = dma.hbm_to_vmem [thread:$0]  %s104_s0, 256, %s15_s7, [#allocation3]  }
   0xc   :  { %82 = dma.done.wait [#allocation3], 256  }
   0xd   :  { %83 = vsyncadd [#allocation3], 4294967040  ;;  %s87_s11 = smov [#allocation5]   ;;  %v21_v0 = vld [vmem:[#allocation2] sm:$0xff]  ;;  %v22_v1 = vld [vmem:[#allocation2 + $0x8] sm:$0xff] }
   0xe   :  { %s31_s12 = sshll.u32 %s87_s11, 4  ;;  %23 = vst [vmem:[#allocation5] sm:$0xff] %v21_v0  ;;  %24 = vst [vmem:[#allocation5 + $0x8] sm:$0xff] %v22_v1  ;;  %s32_s12 = int_to_ptr.vmem [resolvable:$true] %s31_s12 }
   0xf   :  { %s62_s13 = scalar_lea.vmem %s32_s12, 256  ;;  %p67_p6 = scmp.lt.s32.totalorder %s32_s12, %s32_s12 }
  0x10   :  { %p63_p5 = scmp.ne.s32.totalorder %s32_s12, %s62_s13  ;;  %p68_p7 = scmp.lt.s32.totalorder %s62_s13, %s62_s13 }
  0x12   :  { %p69_p8 = por %p68_p7, %p67_p6 }
  0x14   :  { %p70_p9 = pnand %p69_p8, %p63_p5 }
  0x16   :  { %73 = shalt.err (!%p70_p9)
}
  0x17   :  { %34 = dma.vmem_to_hbm [thread:$0]  %s32_s12, 256, %s105_s1, [#allocation4]  }
  0x18   :  { %84 = dma.done.wait [#allocation4], 256  }
  0x19   :  { %85 = vsyncadd [#allocation4], 4294967040 }
  0x1a   :  { %38 = vsyncpa [#allocation3], 1 }
  0x1b   :  { %39 = vsyncpa [#allocation4], 1 }

</bundles_post_ra>
